<compile_context>
chip_gen: v6e
topology: v6e:2x2x1
jax: 0.10.0
libtpu: 0.0.40
codegen_flags: <defaults>
</compile_context>

<pallas_src>
import functools

import jax
import jax.numpy as jnp
from jax.experimental import pallas as pl
from jax.experimental.pallas import tpu as pltpu

NEG_SLOPE = 0.03
LANES = 128        # lane width (last dim alignment)
SUBLANES = 16      # bf16 sublane packing; also satisfies the f32 8-row rule
MAX_TILE_B = 512   # measured sweet spot for mem-bound batch tiles


def _round_up(x, m):
    return ((x + m - 1) // m) * m


def _mlp_kernel(nlayers, *refs):
    """refs = (x_ref, w0_ref, b0_ref, w1_ref, b1_ref, ..., o_ref).

    x_ref : (TILE_B, F0_pad)   bf16
    w_i   : (Fi_pad, Fi1_pad)  bf16  (constant block -> VMEM resident)
    b_i   : (1, Fi1_pad)       f32
    o_ref : (TILE_B, Fout_pad) f32
    Padded lanes are zero-filled, so they stay exactly zero through the chain.
    """
    x_ref = refs[0]
    o_ref = refs[-1]
    params = refs[1:-1]

    h = x_ref[...]                                    # bf16
    for i in range(nlayers - 1):
        w = params[2 * i][...]                        # bf16 (Fin_pad, Fout_pad)
        b = params[2 * i + 1][...]                    # f32  (1, Fout_pad)
        # bf16 MXU operands, f32 accumulate.
        h = jnp.dot(h.astype(jnp.bfloat16), w,
                    preferred_element_type=jnp.float32) + b
        if i < nlayers - 2:
            # leaky_relu(0.03): one vmul + one vmax per vreg.
            h = jnp.maximum(h, NEG_SLOPE * h)
    o_ref[...] = h.astype(o_ref.dtype)


def nonlinear_forward(x, weights, biases):
    """Pallas forward of the torch `Nonlinear` MLP (whole chain in one kernel)."""
    nlayers = len(weights) + 1
    batch, f_in = x.shape
    out_dim = weights[-1].shape[1]

    # ---- lane / sublane aligned padding ------------------------------------
    f_pads = [_round_up(w.shape[0], LANES) for w in weights]
    f_pads.append(_round_up(out_dim, LANES))

    tile_b = min(MAX_TILE_B, _round_up(batch, SUBLANES))
    padded_batch = _round_up(batch, tile_b)
    grid = (padded_batch // tile_b,)

    x_pad = jnp.zeros((padded_batch, f_pads[0]), jnp.bfloat16)
    x_pad = x_pad.at[:batch, :f_in].set(x.astype(jnp.bfloat16))

    args = [x_pad]
    in_specs = [pl.BlockSpec((tile_b, f_pads[0]), lambda i: (i, 0))]
    for li, (w, b) in enumerate(zip(weights, biases)):
        wp = jnp.zeros((f_pads[li], f_pads[li + 1]), jnp.bfloat16)
        wp = wp.at[:w.shape[0], :w.shape[1]].set(w.astype(jnp.bfloat16))
        bp = jnp.zeros((1, f_pads[li + 1]), jnp.float32)
        bp = bp.at[0, :b.shape[0]].set(b.astype(jnp.float32))
        args += [wp, bp]
        # Same block index every grid step -> no re-DMA, stays VMEM resident.
        in_specs += [pl.BlockSpec(wp.shape, lambda i: (0, 0)),
                     pl.BlockSpec(bp.shape, lambda i: (0, 0))]

    out_spec = pl.BlockSpec((tile_b, f_pads[-1]), lambda i: (i, 0))
    out_shape = jax.ShapeDtypeStruct((padded_batch, f_pads[-1]), jnp.float32)

    # ---- explicit VMEM budget (v7x: 64 MiB/TC physical, 32 MiB scoped default)
    est = sum(a.size * a.dtype.itemsize * 2 for a in args[1:])   # params (x2 bufs)
    est += 2 * tile_b * f_pads[0] * 2                            # x, double-buffered
    est += 2 * tile_b * f_pads[-1] * 4                           # out, double-buffered
    est += 4 * tile_b * max(f_pads) * 4                          # live activation slack
    vmem_limit = int(min(64 * 1024 * 1024, max(32 * 1024 * 1024, 2 * est)))

    kernel = functools.partial(_mlp_kernel, nlayers)
    out = pl.pallas_call(
        kernel,
        grid=grid,
        in_specs=in_specs,
        out_specs=out_spec,
        out_shape=out_shape,
        compiler_params=pltpu.CompilerParams(
            dimension_semantics=("parallel",),   # megacore-shardable on v7x
            vmem_limit_bytes=vmem_limit,
        ),
    )(*args)

    # torch: return x.squeeze()
    return jnp.squeeze(out[:batch, :out_dim])


def _reference_forward(x, weights, biases):
    """Pure-JAX reference mirroring the kernel's bf16-operand / f32-accumulate math."""
    h = x.astype(jnp.float32)
    nlayers = len(weights) + 1
    for i, (w, b) in enumerate(zip(weights, biases)):
        hq = h.astype(jnp.bfloat16).astype(jnp.float32)
        wq = w.astype(jnp.bfloat16).astype(jnp.float32)
        h = hq @ wq + b.astype(jnp.float32)
        if i < nlayers - 2:
            h = jnp.maximum(h, NEG_SLOPE * h)
    return jnp.squeeze(h)


if __name__ == "__main__":
    # Equal consecutive sizes: the only configuration where the torch bias
    # shape (layer_sizes[i],) broadcasts exactly as in the original module.
    layer_sizes = [32, 32, 32, 32]
    batch = 2

    key = jax.random.PRNGKey(0)
    weights, biases = [], []
    for i in range(len(layer_sizes) - 1):
        key, kw, kb = jax.random.split(key, 3)
        # torch.randn(layer_size, layer_sizes[i+1])
        weights.append(jax.random.normal(
            kw, (layer_sizes[i], layer_sizes[i + 1]), dtype=jnp.float32))
        # torch.randn(layer_size)
        biases.append(jax.random.normal(kb, (layer_sizes[i],), dtype=jnp.float32))

    key, kx = jax.random.split(key)
    x = jax.random.normal(kx, (batch, layer_sizes[0]), dtype=jnp.float32)

    out = jax.block_until_ready(nonlinear_forward(x, weights, biases))
    ref = _reference_forward(x, weights, biases)

    assert out.shape == ref.shape, (out.shape, ref.shape)
    max_err = float(jnp.max(jnp.abs(out - ref)))
    assert jnp.allclose(out, ref, atol=1e-3, rtol=1e-3), f"mismatch, max_err={max_err}"

    print("KERNEL_OK")
</pallas_src>

<mosaic_0001>
module attributes {stable_mosaic.version = 11 : i64} {
  func.func @_mlp_kernel(%arg0: i32, %arg1: memref<16x128xbf16, #tpu.memory_space<vmem>>, %arg2: memref<128x128xbf16, #tpu.memory_space<vmem>>, %arg3: memref<1x128xf32, #tpu.memory_space<vmem>>, %arg4: memref<128x128xbf16, #tpu.memory_space<vmem>>, %arg5: memref<1x128xf32, #tpu.memory_space<vmem>>, %arg6: memref<128x128xbf16, #tpu.memory_space<vmem>>, %arg7: memref<1x128xf32, #tpu.memory_space<vmem>>, %arg8: memref<16x128xf32, #tpu.memory_space<vmem>>) attributes {dimension_semantics = [#tpu.dimension_semantics<parallel>], iteration_bounds = array<i64: 1>, scalar_prefetch = 0 : i64, scratch_operands = 0 : i64, tpu.core_type = #tpu.core_type<tc>, window_params = [{transform_indices = @transform_0, window_bounds = array<i64: 16, 128>}, {pipeline_mode = #tpu.pipeline_mode<synchronous>, transform_indices = @transform_1, window_bounds = array<i64: 128, 128>}, {pipeline_mode = #tpu.pipeline_mode<synchronous>, transform_indices = @transform_2, window_bounds = array<i64: 1, 128>}, {pipeline_mode = #tpu.pipeline_mode<synchronous>, transform_indices = @transform_3, window_bounds = array<i64: 128, 128>}, {pipeline_mode = #tpu.pipeline_mode<synchronous>, transform_indices = @transform_4, window_bounds = array<i64: 1, 128>}, {pipeline_mode = #tpu.pipeline_mode<synchronous>, transform_indices = @transform_5, window_bounds = array<i64: 128, 128>}, {pipeline_mode = #tpu.pipeline_mode<synchronous>, transform_indices = @transform_6, window_bounds = array<i64: 1, 128>}, {transform_indices = @transform_7, window_bounds = array<i64: 16, 128>}]} {
    %c0 = arith.constant 0 : index
    %c0_0 = arith.constant 0 : index
    %0 = vector.load %arg1[%c0, %c0_0] : memref<16x128xbf16, #tpu.memory_space<vmem>>, vector<16x128xbf16>
    %c0_1 = arith.constant 0 : index
    %c0_2 = arith.constant 0 : index
    %1 = vector.load %arg2[%c0_1, %c0_2] : memref<128x128xbf16, #tpu.memory_space<vmem>>, vector<128x128xbf16>
    %c0_3 = arith.constant 0 : index
    %c0_4 = arith.constant 0 : index
    %2 = vector.load %arg3[%c0_3, %c0_4] : memref<1x128xf32, #tpu.memory_space<vmem>>, vector<1x128xf32>
    %cst = arith.constant dense<0.000000e+00> : vector<16x128xf32>
    %3 = tpu.matmul %0, %1, %cst {dimension_numbers = #tpu.dot_dimension_numbers<[1], [0], [0], [1], [0, 0, 1, 1], [], []>} : vector<16x128xbf16>, vector<128x128xbf16>, vector<16x128xf32> -> vector<16x128xf32>
    %4 = vector.broadcast %2 : vector<1x128xf32> to vector<16x128xf32>
    %5 = arith.addf %3, %4 : vector<16x128xf32>
    %cst_5 = arith.constant 3.000000e-02 : f32
    %6 = vector.broadcast %cst_5 : f32 to vector<16x128xf32>
    %7 = arith.mulf %6, %5 : vector<16x128xf32>
    %8 = arith.maximumf %5, %7 : vector<16x128xf32>
    %c0_6 = arith.constant 0 : index
    %c0_7 = arith.constant 0 : index
    %9 = vector.load %arg4[%c0_6, %c0_7] : memref<128x128xbf16, #tpu.memory_space<vmem>>, vector<128x128xbf16>
    %c0_8 = arith.constant 0 : index
    %c0_9 = arith.constant 0 : index
    %10 = vector.load %arg5[%c0_8, %c0_9] : memref<1x128xf32, #tpu.memory_space<vmem>>, vector<1x128xf32>
    %11 = arith.truncf %8 : vector<16x128xf32> to vector<16x128xbf16>
    %cst_10 = arith.constant dense<0.000000e+00> : vector<16x128xf32>
    %12 = tpu.matmul %11, %9, %cst_10 {dimension_numbers = #tpu.dot_dimension_numbers<[1], [0], [0], [1], [0, 0, 1, 1], [], []>} : vector<16x128xbf16>, vector<128x128xbf16>, vector<16x128xf32> -> vector<16x128xf32>
    %13 = vector.broadcast %10 : vector<1x128xf32> to vector<16x128xf32>
    %14 = arith.addf %12, %13 : vector<16x128xf32>
    %cst_11 = arith.constant 3.000000e-02 : f32
    %15 = vector.broadcast %cst_11 : f32 to vector<16x128xf32>
    %16 = arith.mulf %15, %14 : vector<16x128xf32>
    %17 = arith.maximumf %14, %16 : vector<16x128xf32>
    %c0_12 = arith.constant 0 : index
    %c0_13 = arith.constant 0 : index
    %18 = vector.load %arg6[%c0_12, %c0_13] : memref<128x128xbf16, #tpu.memory_space<vmem>>, vector<128x128xbf16>
    %c0_14 = arith.constant 0 : index
    %c0_15 = arith.constant 0 : index
    %19 = vector.load %arg7[%c0_14, %c0_15] : memref<1x128xf32, #tpu.memory_space<vmem>>, vector<1x128xf32>
    %20 = arith.truncf %17 : vector<16x128xf32> to vector<16x128xbf16>
    %cst_16 = arith.constant dense<0.000000e+00> : vector<16x128xf32>
    %21 = tpu.matmul %20, %18, %cst_16 {dimension_numbers = #tpu.dot_dimension_numbers<[1], [0], [0], [1], [0, 0, 1, 1], [], []>} : vector<16x128xbf16>, vector<128x128xbf16>, vector<16x128xf32> -> vector<16x128xf32>
    %22 = vector.broadcast %19 : vector<1x128xf32> to vector<16x128xf32>
    %23 = arith.addf %21, %22 : vector<16x128xf32>
    %c0_17 = arith.constant 0 : index
    %c0_18 = arith.constant 0 : index
    %24 = vector.load %arg8[%c0_17, %c0_18] : memref<16x128xf32, #tpu.memory_space<vmem>>, vector<16x128xf32>
    tpu.vector_store %arg8[%c0_17, %c0_18], %23 {strides = array<i32>} : memref<16x128xf32, #tpu.memory_space<vmem>>, vector<16x128xf32>,
    return
  }
  func.func @transform_0(%arg0: i32) -> (i32, i32) {
    %c0_i32 = arith.constant 0 : i32
    %c0_i32_0 = arith.constant 0 : i32
    return %arg0, %c0_i32 : i32, i32
  }
  func.func @transform_1(%arg0: i32) -> (i32, i32) {
    %c0_i32 = arith.constant 0 : i32
    %c0_i32_0 = arith.constant 0 : i32
    %c0_i32_1 = arith.constant 0 : i32
    return %c0_i32, %c0_i32_0 : i32, i32
  }
  func.func @transform_2(%arg0: i32) -> (i32, i32) {
    %c0_i32 = arith.constant 0 : i32
    %c0_i32_0 = arith.constant 0 : i32
    %c0_i32_1 = arith.constant 0 : i32
    return %c0_i32, %c0_i32_0 : i32, i32
  }
  func.func @transform_3(%arg0: i32) -> (i32, i32) {
    %c0_i32 = arith.constant 0 : i32
    %c0_i32_0 = arith.constant 0 : i32
    %c0_i32_1 = arith.constant 0 : i32
    return %c0_i32, %c0_i32_0 : i32, i32
  }
  func.func @transform_4(%arg0: i32) -> (i32, i32) {
    %c0_i32 = arith.constant 0 : i32
    %c0_i32_0 = arith.constant 0 : i32
    %c0_i32_1 = arith.constant 0 : i32
    return %c0_i32, %c0_i32_0 : i32, i32
  }
  func.func @transform_5(%arg0: i32) -> (i32, i32) {
    %c0_i32 = arith.constant 0 : i32
    %c0_i32_0 = arith.constant 0 : i32
    %c0_i32_1 = arith.constant 0 : i32
    return %c0_i32, %c0_i32_0 : i32, i32
  }
  func.func @transform_6(%arg0: i32) -> (i32, i32) {
    %c0_i32 = arith.constant 0 : i32
    %c0_i32_0 = arith.constant 0 : i32
    %c0_i32_1 = arith.constant 0 : i32
    return %c0_i32, %c0_i32_0 : i32, i32
  }
  func.func @transform_7(%arg0: i32) -> (i32, i32) {
    %c0_i32 = arith.constant 0 : i32
    %c0_i32_0 = arith.constant 0 : i32
    return %arg0, %c0_i32 : i32, i32
  }
}

</mosaic_0001>

<bundles_post_ra>
// kernel: tpu_custom_call.1
= control target key start
LH: loop header
LB: loop body
LE: loop exit
PB: predicated region body
PF: predicated region fallthrough
CT: control target
= control target key end

     0   :  { %12 = vsyncpa [#allocation3], 0  ;;  %s834_s0 = inlined_call_operand.hbm [shape: bf16[16,128], index: 0, kind: input, shape index: {}]   ;;  %s835_s1 = inlined_call_operand.hbm [shape: bf16[128,128], index: 1, kind: input, shape index: {}]   ;;  %s836_s2 = inlined_call_operand.vmem [shape: f32[1,128], index: 2, kind: input, shape index: {}]   ;;  %s837_s3 = inlined_call_operand.hbm [shape: bf16[128,128], index: 3, kind: input, shape index: {}]   ;;  %s838_s4 = inlined_call_operand.vmem [shape: f32[1,128], index: 4, kind: input, shape index: {}]   ;;  %s839_s5 = inlined_call_operand.hbm [shape: bf16[128,128], index: 5, kind: input, shape index: {}]   ;;  %s840_s6 = inlined_call_operand.vmem [shape: f32[1,128], index: 6, kind: input, shape index: {}]   ;;  %s841_s7 = inlined_call_operand.hbm [shape: f32[16,128], index: 7, kind: output, shape index: {}]  }
   0x1   :  { %13 = vsyncpa [#allocation6], 0 }
   0x2   :  { %14 = vsyncpa [#allocation9], 0 }
   0x3   :  { %15 = vsyncpa [#allocation4], 0  ;;  %s717_s24 = smov [#allocation5]   ;;  %s718_s26 = smov [#allocation2]  }
   0x4   :  { %s33_s25 = sshll.u32 %s717_s24, 4  ;;  %s21_s27 = sshll.u32 %s718_s26, 4  ;;  %s34_s25 = int_to_ptr.vmem [resolvable:$true] %s33_s25  ;;  %s22_s27 = int_to_ptr.vmem [resolvable:$true] %s21_s27 }
   0x5   :  { %s617_s28 = scalar_lea.vmem %s34_s25, 1024  ;;  %p622_p1 = scmp.lt.s32.totalorder %s34_s25, %s34_s25 }
   0x6   :  { %p618_p0 = scmp.ne.s32.totalorder %s34_s25, %s617_s28  ;;  %p623_p2 = scmp.lt.s32.totalorder %s617_s28, %s617_s28 }
   0x8   :  { %p624_p3 = por %p623_p2, %p622_p1 }
   0xa   :  { %p625_p4 = pnand %p624_p3, %p618_p0 }
   0xc   :  { %628 = shalt.err (!%p625_p4)
}
   0xd   :  { %s719_s29 = smov 64   ;;  %s720_s30 = smov 4  }
   0xe   :  { %39 = dma.hbm_to_vmem [thread:$0]  %s835_s1, 1024, %s34_s25, [#allocation6], %s719_s29, %s719_s29, %s720_s30  }
   0xf   :  { %s637_s10 = scalar_lea.vmem %s22_s27, 128  ;;  %p642_p6 = scmp.lt.s32.totalorder %s22_s27, %s22_s27 }
  0x10   :  { %p638_p5 = scmp.ne.s32.totalorder %s22_s27, %s637_s10  ;;  %p643_p7 = scmp.lt.s32.totalorder %s637_s10, %s637_s10 }
  0x12   :  { %p644_p8 = por %p643_p7, %p642_p6 }
  0x14   :  { %p645_p9 = pnand %p644_p8, %p638_p5 }
  0x16   :  { %648 = shalt.err (!%p645_p9)
}
  0x17   :  { %27 = dma.hbm_to_vmem [thread:$0]  %s834_s0, 128, %s22_s27, [#allocation3], %s719_s29, %s719_s29, %s720_s30  }
  0x18   :  { %s721_s13 = smov [#allocation7]   ;;  %s722_s15 = smov [#allocation8]  }
  0x19   :  { %s47_s14 = sshll.u32 %s721_s13, 4  ;;  %s61_s16 = sshll.u32 %s722_s15, 4  ;;  %s48_s14 = int_to_ptr.vmem [resolvable:$true] %s47_s14  ;;  %s62_s16 = int_to_ptr.vmem [resolvable:$true] %s61_s16 }
  0x1a   :  { %s657_s1 = scalar_lea.vmem %s48_s14, 1024  ;;  %p662_p11 = scmp.lt.s32.totalorder %s48_s14, %s48_s14 }
  0x1b   :  { %p658_p10 = scmp.ne.s32.totalorder %s48_s14, %s657_s1  ;;  %p663_p12 = scmp.lt.s32.totalorder %s657_s1, %s657_s1 }
  0x1d   :  { %p664_p13 = por %p663_p12, %p662_p11 }
  0x1f   :  { %p665_p0 = pnand %p664_p13, %p658_p10 }
  0x21   :  { %668 = shalt.err (!%p665_p0)
}
  0x22   :  { %53 = dma.hbm_to_vmem [thread:$0]  %s837_s3, 1024, %s48_s14, [#allocation6], %s719_s29, %s719_s29, %s720_s30  }
  0x23   :  { %s677_s0 = scalar_lea.vmem %s62_s16, 1024  ;;  %p682_p2 = scmp.lt.s32.totalorder %s62_s16, %s62_s16 }
  0x24   :  { %p678_p1 = scmp.ne.s32.totalorder %s62_s16, %s677_s0  ;;  %p683_p3 = scmp.lt.s32.totalorder %s677_s0, %s677_s0 }
  0x26   :  { %p684_p4 = por %p683_p3, %p682_p2 }
  0x28   :  { %p685_p5 = pnand %p684_p4, %p678_p1 }
  0x2a   :  { %688 = shalt.err (!%p685_p5)
}
  0x2b   :  { %67 = dma.hbm_to_vmem [thread:$0]  %s839_s5, 1024, %s62_s16, [#allocation9], %s719_s29, %s719_s29, %s720_s30  }
  0x2c   :  { %709 = dma.done.wait [#allocation3], 128  }
  0x2d   :  { %710 = vsyncadd [#allocation3], 4294967168 }
  0x2e   :  { %711 = dma.done.wait [#allocation6], 2048  }
  0x2f   :  { %712 = vsyncadd [#allocation6], 4294965248 }
  0x30   :  { %713 = dma.done.wait [#allocation9], 1024  }
  0x31   :  { %714 = vsyncadd [#allocation9], 4294966272  ;;  %v723_v0 = vmov 0.0   ;;  %vm724_vm0 = vmmov 0   ;;  %v584_v1 = vld [vmem:[#allocation5 + $0x38] sm:$0xff]   ;;  %v585_v2 = vld [vmem:[#allocation5 + $0x30] sm:$0xff]  }
  0x32   :  { %513 = vmatprep.subr.bf16.mxu0 %v723_v0  ;;  %529 = vmatprep.mubr.msk.bf16.mxu0 %vm724_vm0, %v723_v0  ;;  %v586_v3 = vld [vmem:[#allocation5 + $0x28] sm:$0xff]   ;;  %v593_v4 = vld [vmem:[#allocation7 + $0x38] sm:$0xff]   ;;  %v587_v5 = vld [vmem:[#allocation5 + $0x20] sm:$0xff]   ;;  %s725_s24 = smov [#allocation10]  }
  0x33   :  { %533 = vmatprep.subr.bf16.mxu1 %v723_v0  ;;  %549 = vmatprep.mubr.msk.bf16.mxu1 %vm724_vm0, %v723_v0  ;;  %v594_v6 = vld [vmem:[#allocation7 + $0x30] sm:$0xff]   ;;  %v588_v7 = vld [vmem:[#allocation5 + $0x18] sm:$0xff]   ;;  %v595_v8 = vld [vmem:[#allocation7 + $0x28] sm:$0xff]  }
  0x34   :  { %514 = vmatpush3.bf16.msra.mxu0 %v584_v1  ;;  %534 = vmatpush3.bf16.msra.mxu1 %v593_v4  ;;  %v589_v9 = vld [vmem:[#allocation5 + $0x10] sm:$0xff]   ;;  %v596_v10 = vld [vmem:[#allocation7 + $0x20] sm:$0xff]   ;;  %v590_v11 = vld [vmem:[#allocation5 + $0x8] sm:$0xff]  }
  0x35   :  { %515 = vmatprep.subr.bf16.mxu0 %v723_v0  ;;  %535 = vmatprep.subr.bf16.mxu1 %v723_v0  ;;  %v597_v12 = vld [vmem:[#allocation7 + $0x18] sm:$0xff]   ;;  %v591_v13 = vld [vmem:[#allocation5] sm:$0xff]   ;;  %v598_v15 = vld [vmem:[#allocation7 + $0x10] sm:$0xff]  }
  0x36   :  { %v592_v14 = vld [vmem:[#allocation2] sm:$0xff]   ;;  %v599_v16 = vld [vmem:[#allocation7 + $0x8] sm:$0xff]   ;;  %v600_v17 = vld [vmem:[#allocation7] sm:$0xff]  }
  0x37   :  { %v601_v18 = vld [vmem:[#allocation8 + $0x38] sm:$0xff]   ;;  %v602_v19 = vld [vmem:[#allocation8 + $0x30] sm:$0xff]   ;;  %v603_v20 = vld [vmem:[#allocation8 + $0x28] sm:$0xff]  }
  0x38   :  { %516 = vmatpush3.bf16.msra.mxu0 %v585_v2  ;;  %536 = vmatpush3.bf16.msra.mxu1 %v594_v6  ;;  %v604_v21 = vld [vmem:[#allocation8 + $0x20] sm:$0xff]   ;;  %v605_v22 = vld [vmem:[#allocation8 + $0x18] sm:$0xff]   ;;  %v606_v35 = vld [vmem:[#allocation8 + $0x10] sm:$0xff]  }
  0x39   :  { %517 = vmatprep.subr.bf16.mxu0 %v723_v0  ;;  %537 = vmatprep.subr.bf16.mxu1 %v723_v0  ;;  %v458_v23 = vld [vmem:[%s836_s2] ss:$0 sm:$0xff]  ;;  %v607_v36 = vld [vmem:[#allocation8 + $0x8] sm:$0xff]   ;;  %v608_v37 = vld [vmem:[#allocation8] sm:$0xff]  }
  0x3a   :  { %v468_v38 = vld [vmem:[%s838_s4] ss:$0 sm:$0xff]  ;;  %s444_s4 = sshll.u32 %s725_s24, 4  ;;  %s445_s4 = int_to_ptr.vmem [resolvable:$true] %s444_s4 }
  0x3b   :  { %v477_v50 = vld [vmem:[%s840_s6] ss:$0 sm:$0xff]  ;;  %s689_s25 = scalar_lea.vmem %s445_s4, 256  ;;  %p694_p7 = scmp.lt.s32.totalorder %s445_s4, %s445_s4 }
  0x3c   :  { %518 = vmatpush3.bf16.msra.mxu0 %v586_v3  ;;  %538 = vmatpush3.bf16.msra.mxu1 %v595_v8  ;;  %p690_p6 = scmp.ne.s32.totalorder %s445_s4, %s689_s25  ;;  %p695_p8 = scmp.lt.s32.totalorder %s689_s25, %s689_s25 }
  0x3d   :  { %519 = vmatprep.subr.bf16.mxu0 %v723_v0  ;;  %539 = vmatprep.subr.bf16.mxu1 %v723_v0 }
  0x3e   :  { %p696_p9 = por %p695_p8, %p694_p7 }
  0x40   :  { %520 = vmatpush3.bf16.msra.mxu0 %v587_v5  ;;  %540 = vmatpush3.bf16.msra.mxu1 %v596_v10  ;;  %p697_p10 = pnand %p696_p9, %p690_p6 }
  0x41   :  { %521 = vmatprep.subr.bf16.mxu0 %v723_v0  ;;  %541 = vmatprep.subr.bf16.mxu1 %v723_v0 }
  0x44   :  { %522 = vmatpush3.bf16.msra.mxu0 %v588_v7  ;;  %542 = vmatpush3.bf16.msra.mxu1 %v597_v12 }
  0x45   :  { %523 = vmatprep.subr.bf16.mxu0 %v723_v0  ;;  %543 = vmatprep.subr.bf16.mxu1 %v723_v0 }
  0x48   :  { %524 = vmatpush3.bf16.msra.mxu0 %v589_v9  ;;  %544 = vmatpush3.bf16.msra.mxu1 %v598_v15 }
  0x49   :  { %525 = vmatprep.subr.bf16.mxu0 %v723_v0  ;;  %545 = vmatprep.subr.bf16.mxu1 %v723_v0 }
  0x4c   :  { %526 = vmatpush3.bf16.msra.mxu0 %v590_v11  ;;  %546 = vmatpush3.bf16.msra.mxu1 %v599_v16 }
  0x4d   :  { %527 = vmatprep.subr.bf16.mxu0 %v723_v0  ;;  %547 = vmatprep.subr.bf16.mxu1 %v723_v0 }
  0x50   :  { %528 = vmatpush3.bf16.msra.mxu0 %v591_v13  ;;  %548 = vmatpush3.bf16.msra.mxu1 %v600_v17 }
  0x51   :  { %553 = vmatprep.subr.bf16.mxu0 %v723_v0 }
  0x53   :  { %530 = vmatmul.mubr.bf16.vlgmr.msra.gmra.mxu0 %v592_v14 }
  0x54   :  { %569 = vmatprep.mubr.msk.bf16.mxu0 %vm724_vm0, %v723_v0  ;;  %554 = vmatpush3.bf16.msra.mxu0 %v601_v18 }
  0x55   :  { %555 = vmatprep.subr.bf16.mxu0 %v723_v0 }
  0x58   :  { %556 = vmatpush3.bf16.msra.mxu0 %v602_v19 }
  0x59   :  { %557 = vmatprep.subr.bf16.mxu0 %v723_v0 }
  0x5c   :  { %558 = vmatpush3.bf16.msra.mxu0 %v603_v20 }
  0x5d   :  { %559 = vmatprep.subr.bf16.mxu0 %v723_v0 }
  0x60   :  { %560 = vmatpush3.bf16.msra.mxu0 %v604_v21 }
  0x61   :  { %561 = vmatprep.subr.bf16.mxu0 %v723_v0 }
  0x64   :  { %562 = vmatpush3.bf16.msra.mxu0 %v605_v22 }
  0x65   :  { %563 = vmatprep.subr.bf16.mxu0 %v723_v0 }
  0x68   :  { %564 = vmatpush3.bf16.msra.mxu0 %v606_v35 }
  0x69   :  { %565 = vmatprep.subr.bf16.mxu0 %v723_v0 }
  0x6c   :  { %566 = vmatpush3.bf16.msra.mxu0 %v607_v36 }
  0x6d   :  { %567 = vmatprep.subr.bf16.mxu0 %v723_v0 }
  0x70   :  { %568 = vmatpush3.bf16.msra.mxu0 %v608_v37 }
 0x113   :  { %v196_v24 = vpop.f32.mrf.mxu0 }
 0x114   :  { %v197_v25 = vadd.f32 %v458_v23, %v196_v24 }
 0x115   :  { %v531_v26 = vpop.f32.mrf.mxu0 }
 0x116   :  { %v203_v28 = vmul.f32 0.03, %v197_v25 }
 0x117   :  { %v199_v27 = vpop.f32.mrf.mxu0 }
 0x118   :  { %v200_v29 = vadd.f32 %v458_v23, %v199_v27  ;;  %v205_v32 = vmax.f32 %v197_v25, %v203_v28 }
 0x119   :  { %v532_v30 = vpop.f32.mrf.mxu0 }
 0x11a   :  { %v204_v31 = vmul.f32 0.03, %v200_v29 }
 0x11c   :  { %v206_v33 = vmax.f32 %v200_v29, %v204_v31 }
 0x11e   :  { %v224_v34 = vpack.c.bf16 %v206_v33, %v205_v32 }
 0x120   :  { %550 = vmatmul.mubr.bf16.vlgmr.msra.gmra.mxu1 %v224_v34 }
 0x1e0   :  { %v313_v39 = vpop.f32.mrf.mxu1 }
 0x1e1   :  { %v314_v40 = vadd.f32 %v468_v38, %v313_v39 }
 0x1e2   :  { %v551_v41 = vpop.f32.mrf.mxu1 }
 0x1e3   :  { %v320_v43 = vmul.f32 0.03, %v314_v40 }
 0x1e4   :  { %v316_v42 = vpop.f32.mrf.mxu1 }
 0x1e5   :  { %v317_v44 = vadd.f32 %v468_v38, %v316_v42  ;;  %v322_v47 = vmax.f32 %v314_v40, %v320_v43 }
 0x1e6   :  { %v552_v45 = vpop.f32.mrf.mxu1 }
 0x1e7   :  { %v321_v46 = vmul.f32 0.03, %v317_v44 }
 0x1e9   :  { %v323_v48 = vmax.f32 %v317_v44, %v321_v46 }
 0x1eb   :  { %v341_v49 = vpack.c.bf16 %v323_v48, %v322_v47 }
 0x1ed   :  { %570 = vmatmul.mubr.bf16.vlgmr.msra.gmra.mxu0 %v341_v49 }
 0x2ad   :  { %v430_v51 = vpop.f32.mrf.mxu0 }
 0x2ae   :  { %v431_v52 = vadd.f32 %v477_v50, %v430_v51 }
 0x2af   :  { %v571_v53 = vpop.f32.mrf.mxu0 }
 0x2b0   :  { %437 = vst [vmem:[#allocation10] sm:$0xff] %v431_v52 }
 0x2b1   :  { %v433_v54 = vpop.f32.mrf.mxu0 }
 0x2b2   :  { %v434_v55 = vadd.f32 %v477_v50, %v433_v54 }
 0x2b3   :  { %v572_v56 = vpop.f32.mrf.mxu0 }
 0x2b4   :  { %438 = vst [vmem:[#allocation10 + $0x8] sm:$0xff] %v434_v55 }
 0x2b5   :  { %700 = shalt.err (!%p697_p10)
}
 0x2b6   :  { %s726_s26 = smov 128   ;;  %s727_s6 = smov 8  }
 0x2b7   :  { %450 = dma.vmem_to_hbm [thread:$0]  %s445_s4, 256, %s841_s7, [#allocation4], %s726_s26, %s726_s26, %s727_s6  }
 0x2b8   :  { %715 = dma.done.wait [#allocation4], 256  }
 0x2b9   :  { %716 = vsyncadd [#allocation4], 4294967040 }
 0x2ba   :  { %454 = vsyncpa [#allocation3], 1 }
 0x2bb   :  { %455 = vsyncpa [#allocation6], 1 }
 0x2bc   :  { %456 = vsyncpa [#allocation9], 1 }
 0x2bd   :  { %457 = vsyncpa [#allocation4], 1 }

</bundles_post_ra>
